<compile_context>
chip_gen: v7x
topology: tpu7x:2x2x1
jax: 0.10.0
libtpu: 0.0.40
codegen_flags: <defaults>
</compile_context>

<pallas_src>
import jax
import jax.numpy as jnp
import numpy as np
from jax import lax
from jax.experimental import pallas as pl
from jax.experimental.pallas import tpu as pltpu


_DN_BT = (((1,), (1,)), ((), ()))   # contract last dims of both:  A @ B^T
_DN_AB = (((1,), (0,)), ((), ()))   # plain matmul:                A @ B

# Channel counts up to this are fully unrolled (free static slices); above it
# a fori_loop keeps trace size / vreg pressure bounded.
_UNROLL_CHANNELS = 16


def _biaffine_kernel(x1_ref, x2_ref, wc_ref, u_ref, v_ref, c_ref, o_ref,
                     tmp_ref, vx_ref):
    """One (batch, L2-tile) grid step.

    x1_ref : [L1, D1]    bf16       x2_ref : [TL2, D2]  bf16
    wc_ref : [O*D2, D1]  bf16       u_ref  : [O, D2]    bf16
    v_ref  : [O, D1]     bf16       c_ref  : [1, O]     f32
    o_ref  : [O, TL2, L1] f32   (channel-leading block of [B, O, L2, L1])
    tmp_ref: [O*D2, L1]  bf16 scratch (stage-1 cache, one per batch element)
    vx_ref : [O, L1]     f32  scratch (x1-only bias term, one per batch)
    """
    d2 = x2_ref.shape[1]
    n_out = v_ref.shape[0]

    # ---- Stage 1: only on the first L2 tile of each batch element ----------
    # Grid axis 1 is "arbitrary" (sequential per core), so tmp/vx computed at
    # t == 0 stay resident in VMEM scratch for every later tile of this batch.
    @pl.when(pl.program_id(1) == 0)
    def _():
        x1 = x1_ref[...]
        # tmp[o*D2 + k, l] = sum_d Wc[o*D2 + k, d] * x1[l, d]
        # Channel-major rows: per-channel reads below are sublane slices.
        # NOTE: tmp is kept bf16 (extra rounding of a D1-length accumulation);
        # validated at the demo size, revisit tolerance for very large D1.
        tmp_ref[...] = lax.dot_general(
            wc_ref[...], x1, _DN_BT,
            preferred_element_type=jnp.float32).astype(jnp.bfloat16)
        # vx[o, l] = sum_d V[o, d] * x1[l, d]   (x1-only bias term)
        vx_ref[...] = lax.dot_general(
            v_ref[...], x1, _DN_BT, preferred_element_type=jnp.float32)

    # ---- Per-tile work ------------------------------------------------------
    x2 = x2_ref[...]                                                # [TL2, D2]
    # ux[m, o] = sum_k x2[m, k] * U[o, k] + c[o]   (x2-only bias + corner)
    ux = lax.dot_general(x2, u_ref[...], _DN_BT,
                         preferred_element_type=jnp.float32) + c_ref[...]

    def emit_channel(o, t_o, u_o, v_o):
        # s_o[m, l] = sum_k x2[m, k] * tmp[o*D2 + k, l]  -- plain A @ B on MXU.
        s_o = lax.dot_general(x2, t_o, _DN_AB,
                              preferred_element_type=jnp.float32)   # [TL2, L1]
        # Leading-dim store: full, lane-dense [TL2, L1] block per channel.
        o_ref[o] = s_o + u_o + v_o

    if n_out <= _UNROLL_CHANNELS:
        # Small channel counts: fully unrolled, static (zero-cost) slices.
        for o in range(n_out):
            emit_channel(o,
                         tmp_ref[o * d2:(o + 1) * d2, :],
                         ux[:, o:o + 1],
                         vx_ref[o:o + 1, :])
    else:
        # Large channel counts: bounded live ranges / constant vreg pressure.
        def body(o, carry):
            start = pl.multiple_of(o * d2, d2)
            emit_channel(o,
                         tmp_ref[pl.ds(start, d2), :],
                         lax.dynamic_slice_in_dim(ux, o, 1, axis=1),
                         vx_ref[pl.ds(o, 1), :])
            return carry
        lax.fori_loop(0, n_out, body, 0, unroll=4)


def _per_step_vmem_bytes(tl2, l1, d1, d2, o):
    out_blk = 2 * o * tl2 * l1 * 4          # double-buffered fp32 output block
    x2_blk = 2 * tl2 * d2 * 2               # double-buffered bf16 x2 block
    x1_blk = 2 * l1 * d1 * 2
    weights = 2 * (o * d2 * d1 + o * d2 + o * d1) * 2 + 2 * o * 4
    scratch = o * d2 * l1 * 2 + o * l1 * 4
    return out_blk + x2_blk + x1_blk + weights + scratch


def biaffine_pallas(input1, input2, weight, out_features, bias=(True, True)):
    """input1: [B, L1, D1], input2: [B, L2, D2], weight: [out*(D2+b1), D1+b0].

    Returns [B, L2, L1, out_features] (float32), matching the PyTorch module.
    """
    B, L1, D1 = input1.shape
    B2, L2, D2 = input2.shape
    assert B == B2
    D1p = D1 + int(bias[0])
    D2p = D2 + int(bias[1])
    assert weight.shape == (out_features * D2p, D1p)
    O = out_features

    # --- One-time, weight-only split of the constant-1 features -------------
    w3 = weight.astype(jnp.float32).reshape(O, D2p, D1p)
    wc = w3[:, :D2, :D1].reshape(O * D2, D1)
    u = w3[:, :D2, D1] if bias[0] else jnp.zeros((O, D2), jnp.float32)
    v = w3[:, D2, :D1] if bias[1] else jnp.zeros((O, D1), jnp.float32)
    if bias[0] and bias[1]:
        c = w3[:, D2, D1].reshape(1, O)
    else:
        c = jnp.zeros((1, O), jnp.float32)

    wc = wc.astype(jnp.bfloat16)
    u = u.astype(jnp.bfloat16)
    v = v.astype(jnp.bfloat16)

    # bf16 activations at the boundary: halves streamed DMA volume and removes
    # the per-tile VPU casts inside the kernel (fp32 accumulation kept inside).
    x1 = input1.astype(jnp.bfloat16)
    x2 = input2.astype(jnp.bfloat16)

    # --- VMEM budget / tile-size heuristics (chip-aware) ---------------------
    try:
        vmem_cap = int(pltpu.get_tpu_info().vmem_capacity_bytes)
    except Exception:
        vmem_cap = 64 * 1024 * 1024          # conservative (v7x-sized) fallback
    vmem_limit = max(32 * 1024 * 1024,
                     min((vmem_cap * 3) // 4, 100 * 1024 * 1024))

    # Larger L2 tiles on 128 MiB-VMEM parts (v5e/v6e), modest on 64 MiB (v7x).
    tl2 = min(L2, 512 if vmem_cap >= 96 * 1024 * 1024 else 256)
    budget = (vmem_limit * 4) // 5
    while tl2 > 8 and _per_step_vmem_bytes(tl2, L1, D1, D2, O) > budget:
        tl2 = max(8, ((tl2 // 2) // 8) * 8)

    # Invariant (constant-index) weight operands: single-buffer them when the
    # core weight is large so v7x's 64 MiB VMEM is not wasted on a dead copy.
    weight_single_buffer = (wc.size * 2) > (4 * 1024 * 1024)

    def _const_spec(shape):
        if weight_single_buffer:
            return pl.BlockSpec(shape, lambda b, t: (0, 0),
                                pipeline_mode=pl.Buffered(1))
        return pl.BlockSpec(shape, lambda b, t: (0, 0))

    grid = (B, pl.cdiv(L2, tl2))

    out_cm = pl.pallas_call(
        _biaffine_kernel,
        out_shape=jax.ShapeDtypeStruct((B, O, L2, L1), jnp.float32),
        grid=grid,
        in_specs=[
            pl.BlockSpec((None, L1, D1), lambda b, t: (b, 0, 0)),
            pl.BlockSpec((None, tl2, D2), lambda b, t: (b, t, 0)),
            _const_spec((O * D2, D1)),
            _const_spec((O, D2)),
            _const_spec((O, D1)),
            _const_spec((1, O)),
        ],
        out_specs=pl.BlockSpec((None, O, tl2, L1), lambda b, t: (b, 0, t, 0)),
        scratch_shapes=[
            pltpu.VMEM((O * D2, L1), jnp.bfloat16),   # stage-1 cache
            pltpu.VMEM((O, L1), jnp.float32),         # x1-only bias term
        ],
        compiler_params=pltpu.CompilerParams(
            # Batch stays "parallel" (megacore / v7x dual-TC); the L2-tile axis
            # must be "arbitrary" so the stage-1 scratch carries across tiles.
            dimension_semantics=("parallel", "arbitrary"),
            vmem_limit_bytes=vmem_limit),
    )(x1, x2, wc, u, v, c)

    # [B, O, L2, L1] -> [B, L2, L1, O] to match the PyTorch layout.
    # TODO(synk): this permute re-streams the full result through HBM; a
    # consumer that accepts channel-leading scores (or fuses the permute into
    # its own first op) would skip this extra pass entirely.
    return jnp.transpose(out_cm, (0, 2, 3, 1))


def biaffine_reference(input1, input2, weight, out_features, bias=(True, True)):
    """Pure-JAX fp32 reference mirroring the PyTorch forward exactly."""
    B, L1, D1 = input1.shape
    _, L2, D2 = input2.shape
    x1 = input1.astype(jnp.float32)
    x2 = input2.astype(jnp.float32)
    if bias[0]:
        x1 = jnp.concatenate([x1, jnp.ones((B, L1, 1), jnp.float32)], axis=2)
    if bias[1]:
        x2 = jnp.concatenate([x2, jnp.ones((B, L2, 1), jnp.float32)], axis=2)
    D2p = x2.shape[-1]
    affine = jnp.einsum("bld,ed->ble", x1, weight.astype(jnp.float32))
    affine = affine.reshape(B, L1 * out_features, D2p)
    scores = jnp.einsum("brk,bmk->brm", affine, x2)
    scores = jnp.transpose(scores, (0, 2, 1)).reshape(B, L2, L1, out_features)
    return scores


def _run_case(key, B, L1, L2, D1, D2, out_features, bias, zero_weight=False):
    k1, k2, kw = jax.random.split(key, 3)
    x1 = jax.random.normal(k1, (B, L1, D1), jnp.float32)
    x2 = jax.random.normal(k2, (B, L2, D2), jnp.float32)
    D1p = D1 + int(bias[0])
    D2p = D2 + int(bias[1])
    if zero_weight:
        # Matches the module's reset_parameters() (zero init).
        w = jnp.zeros((out_features * D2p, D1p), jnp.float32)
    else:
        w = 0.1 * jax.random.normal(kw, (out_features * D2p, D1p), jnp.float32)

    out = jax.block_until_ready(biaffine_pallas(x1, x2, w, out_features, bias))
    ref = biaffine_reference(x1, x2, w, out_features, bias)
    assert out.shape == (B, L2, L1, out_features)
    # bf16 operands / fp32 accumulation vs fp32 reference -> ~1e-2 tolerance.
    np.testing.assert_allclose(np.asarray(out), np.asarray(ref),
                               rtol=2e-2, atol=3e-2)
    return out


if __name__ == "__main__":
    B, L1, L2 = 2, 8, 8
    in1_features, in2_features, out_features = 32, 32, 4

    key = jax.random.PRNGKey(0)
    k_a, k_b = jax.random.split(key)

    _run_case(k_a, B, L1, L2, in1_features, in2_features, out_features,
              bias=(True, True))
    _run_case(k_b, B, L1, L2, in1_features, in2_features, out_features,
              bias=(True, False))
    _run_case(k_a, B, L1, L2, in1_features, in2_features, out_features,
              bias=(True, True), zero_weight=True)

    print("KERNEL_OK")
</pallas_src>

<mosaic_0001>
module attributes {stable_mosaic.version = 11 : i64} {
  func.func @_biaffine_kernel(%arg0: i32, %arg1: i32, %arg2: memref<1x8x32xbf16, #tpu.memory_space<vmem>>, %arg3: memref<1x8x32xbf16, #tpu.memory_space<vmem>>, %arg4: memref<128x32xbf16, #tpu.memory_space<vmem>>, %arg5: memref<4x32xbf16, #tpu.memory_space<vmem>>, %arg6: memref<4x32xbf16, #tpu.memory_space<vmem>>, %arg7: memref<1x4xf32, #tpu.memory_space<vmem>>, %arg8: memref<1x4x8x8xf32, #tpu.memory_space<vmem>>, %arg9: memref<128x8xbf16, #tpu.memory_space<vmem>>, %arg10: memref<4x8xf32, #tpu.memory_space<vmem>>) attributes {dimension_semantics = [#tpu.dimension_semantics<parallel>, #tpu.dimension_semantics<arbitrary>], iteration_bounds = array<i64: 2, 1>, scalar_prefetch = 0 : i64, scratch_operands = 2 : i64, tpu.core_type = #tpu.core_type<tc>, window_params = [{transform_indices = @transform_0, window_bounds = array<i64: 1, 8, 32>}, {transform_indices = @transform_1, window_bounds = array<i64: 1, 8, 32>}, {pipeline_mode = #tpu.pipeline_mode<synchronous>, transform_indices = @transform_2, window_bounds = array<i64: 128, 32>}, {pipeline_mode = #tpu.pipeline_mode<synchronous>, transform_indices = @transform_3, window_bounds = array<i64: 4, 32>}, {pipeline_mode = #tpu.pipeline_mode<synchronous>, transform_indices = @transform_4, window_bounds = array<i64: 4, 32>}, {pipeline_mode = #tpu.pipeline_mode<synchronous>, transform_indices = @transform_5, window_bounds = array<i64: 1, 4>}, {transform_indices = @transform_6, window_bounds = array<i64: 1, 4, 8, 8>}]} {
    %c0_i32 = arith.constant 0 : i32
    %0 = arith.cmpi eq, %arg1, %c0_i32 : i32
    %1 = arith.extui %0 : i1 to i32
    %c0_i32_0 = arith.constant 0 : i32
    %2 = arith.cmpi ne, %1, %c0_i32_0 : i32
    scf.if %2 {
      %c0_37 = arith.constant 0 : index
      %c0_38 = arith.constant 0 : index
      %c0_39 = arith.constant 0 : index
      %54 = vector.load %arg2[%c0_37, %c0_38, %c0_39] : memref<1x8x32xbf16, #tpu.memory_space<vmem>>, vector<1x8x32xbf16>
      %55 = vector.shape_cast %54 : vector<1x8x32xbf16> to vector<8x32xbf16>
      %c0_40 = arith.constant 0 : index
      %c0_41 = arith.constant 0 : index
      %56 = vector.load %arg4[%c0_40, %c0_41] : memref<128x32xbf16, #tpu.memory_space<vmem>>, vector<128x32xbf16>
      %cst_42 = arith.constant dense<0.000000e+00> : vector<128x8xf32>
      %57 = tpu.matmul %56, %55, %cst_42 {dimension_numbers = #tpu.dot_dimension_numbers<[1], [1], [0], [0], [0, 0, 1, 0], [], []>} : vector<128x32xbf16>, vector<8x32xbf16>, vector<128x8xf32> -> vector<128x8xf32>
      %58 = arith.truncf %57 : vector<128x8xf32> to vector<128x8xbf16>
      %c0_43 = arith.constant 0 : index
      %c0_44 = arith.constant 0 : index
      %59 = vector.load %arg9[%c0_43, %c0_44] : memref<128x8xbf16, #tpu.memory_space<vmem>>, vector<128x8xbf16>
      tpu.vector_store %arg9[%c0_43, %c0_44], %58 {strides = array<i32>} : memref<128x8xbf16, #tpu.memory_space<vmem>>, vector<128x8xbf16>,
      %c0_45 = arith.constant 0 : index
      %c0_46 = arith.constant 0 : index
      %60 = vector.load %arg6[%c0_45, %c0_46] : memref<4x32xbf16, #tpu.memory_space<vmem>>, vector<4x32xbf16>
      %cst_47 = arith.constant dense<0.000000e+00> : vector<4x8xf32>
      %61 = tpu.matmul %60, %55, %cst_47 {dimension_numbers = #tpu.dot_dimension_numbers<[1], [1], [0], [0], [0, 0, 1, 0], [], []>} : vector<4x32xbf16>, vector<8x32xbf16>, vector<4x8xf32> -> vector<4x8xf32>
      %c0_48 = arith.constant 0 : index
      %c0_49 = arith.constant 0 : index
      %62 = vector.load %arg10[%c0_48, %c0_49] : memref<4x8xf32, #tpu.memory_space<vmem>>, vector<4x8xf32>
      tpu.vector_store %arg10[%c0_48, %c0_49], %61 {strides = array<i32>} : memref<4x8xf32, #tpu.memory_space<vmem>>, vector<4x8xf32>,
    } else {
    }
    %c0 = arith.constant 0 : index
    %c0_1 = arith.constant 0 : index
    %c0_2 = arith.constant 0 : index
    %3 = vector.load %arg3[%c0, %c0_1, %c0_2] : memref<1x8x32xbf16, #tpu.memory_space<vmem>>, vector<1x8x32xbf16>
    %4 = vector.shape_cast %3 : vector<1x8x32xbf16> to vector<8x32xbf16>
    %c0_3 = arith.constant 0 : index
    %c0_4 = arith.constant 0 : index
    %5 = vector.load %arg5[%c0_3, %c0_4] : memref<4x32xbf16, #tpu.memory_space<vmem>>, vector<4x32xbf16>
    %cst = arith.constant dense<0.000000e+00> : vector<8x4xf32>
    %6 = tpu.matmul %4, %5, %cst {dimension_numbers = #tpu.dot_dimension_numbers<[1], [1], [0], [0], [0, 0, 1, 0], [], []>} : vector<8x32xbf16>, vector<4x32xbf16>, vector<8x4xf32> -> vector<8x4xf32>
    %c0_5 = arith.constant 0 : index
    %c0_6 = arith.constant 0 : index
    %7 = vector.load %arg7[%c0_5, %c0_6] : memref<1x4xf32, #tpu.memory_space<vmem>>, vector<1x4xf32>
    %8 = vector.broadcast %7 : vector<1x4xf32> to vector<8x4xf32>
    %9 = arith.addf %6, %8 : vector<8x4xf32>
    %c0_7 = arith.constant 0 : index
    %c0_8 = arith.constant 0 : index
    %10 = vector.load %arg9[%c0_7, %c0_8] : memref<128x8xbf16, #tpu.memory_space<vmem>>, vector<32x8xbf16>
    %11 = vector.extract_strided_slice %9 {offsets = [0, 0], sizes = [8, 1], strides = [1, 1]} : vector<8x4xf32> to vector<8x1xf32>
    %c0_9 = arith.constant 0 : index
    %c0_10 = arith.constant 0 : index
    %12 = vector.load %arg10[%c0_9, %c0_10] : memref<4x8xf32, #tpu.memory_space<vmem>>, vector<1x8xf32>
    %cst_11 = arith.constant dense<0.000000e+00> : vector<8x8xf32>
    %13 = tpu.matmul %4, %10, %cst_11 {dimension_numbers = #tpu.dot_dimension_numbers<[1], [0], [0], [1], [0, 0, 1, 1], [], []>} : vector<8x32xbf16>, vector<32x8xbf16>, vector<8x8xf32> -> vector<8x8xf32>
    %14 = vector.broadcast %11 : vector<8x1xf32> to vector<8x8xf32>
    %15 = arith.addf %13, %14 : vector<8x8xf32>
    %16 = vector.broadcast %12 : vector<1x8xf32> to vector<8x8xf32>
    %17 = arith.addf %15, %16 : vector<8x8xf32>
    %c0_12 = arith.constant 0 : index
    %c0_13 = arith.constant 0 : index
    %c0_14 = arith.constant 0 : index
    %c0_15 = arith.constant 0 : index
    %18 = vector.load %arg8[%c0_12, %c0_13, %c0_14, %c0_15] : memref<1x4x8x8xf32, #tpu.memory_space<vmem>>, vector<1x1x8x8xf32>
    %19 = vector.shape_cast %18 : vector<1x1x8x8xf32> to vector<8x8xf32>
    %20 = vector.shape_cast %17 : vector<8x8xf32> to vector<1x1x8x8xf32>
    tpu.vector_store %arg8[%c0_12, %c0_13, %c0_14, %c0_15], %20 {strides = array<i32>} : memref<1x4x8x8xf32, #tpu.memory_space<vmem>>, vector<1x1x8x8xf32>,
    %c32 = arith.constant 32 : index
    %c0_16 = arith.constant 0 : index
    %21 = vector.load %arg9[%c32, %c0_16] : memref<128x8xbf16, #tpu.memory_space<vmem>>, vector<32x8xbf16>
    %22 = vector.extract_strided_slice %9 {offsets = [0, 1], sizes = [8, 1], strides = [1, 1]} : vector<8x4xf32> to vector<8x1xf32>
    %c1 = arith.constant 1 : index
    %c0_17 = arith.constant 0 : index
    %23 = vector.load %arg10[%c1, %c0_17] : memref<4x8xf32, #tpu.memory_space<vmem>>, vector<1x8xf32>
    %cst_18 = arith.constant dense<0.000000e+00> : vector<8x8xf32>
    %24 = tpu.matmul %4, %21, %cst_18 {dimension_numbers = #tpu.dot_dimension_numbers<[1], [0], [0], [1], [0, 0, 1, 1], [], []>} : vector<8x32xbf16>, vector<32x8xbf16>, vector<8x8xf32> -> vector<8x8xf32>
    %25 = vector.broadcast %22 : vector<8x1xf32> to vector<8x8xf32>
    %26 = arith.addf %24, %25 : vector<8x8xf32>
    %27 = vector.broadcast %23 : vector<1x8xf32> to vector<8x8xf32>
    %28 = arith.addf %26, %27 : vector<8x8xf32>
    %c0_19 = arith.constant 0 : index
    %c1_20 = arith.constant 1 : index
    %c0_21 = arith.constant 0 : index
    %c0_22 = arith.constant 0 : index
    %29 = vector.load %arg8[%c0_19, %c1_20, %c0_21, %c0_22] : memref<1x4x8x8xf32, #tpu.memory_space<vmem>>, vector<1x1x8x8xf32>
    %30 = vector.shape_cast %29 : vector<1x1x8x8xf32> to vector<8x8xf32>
    %31 = vector.shape_cast %28 : vector<8x8xf32> to vector<1x1x8x8xf32>
    tpu.vector_store %arg8[%c0_19, %c1_20, %c0_21, %c0_22], %31 {strides = array<i32>} : memref<1x4x8x8xf32, #tpu.memory_space<vmem>>, vector<1x1x8x8xf32>,
    %c64 = arith.constant 64 : index
    %c0_23 = arith.constant 0 : index
    %32 = vector.load %arg9[%c64, %c0_23] : memref<128x8xbf16, #tpu.memory_space<vmem>>, vector<32x8xbf16>
    %33 = vector.extract_strided_slice %9 {offsets = [0, 2], sizes = [8, 1], strides = [1, 1]} : vector<8x4xf32> to vector<8x1xf32>
    %c2 = arith.constant 2 : index
    %c0_24 = arith.constant 0 : index
    %34 = vector.load %arg10[%c2, %c0_24] : memref<4x8xf32, #tpu.memory_space<vmem>>, vector<1x8xf32>
    %cst_25 = arith.constant dense<0.000000e+00> : vector<8x8xf32>
    %35 = tpu.matmul %4, %32, %cst_25 {dimension_numbers = #tpu.dot_dimension_numbers<[1], [0], [0], [1], [0, 0, 1, 1], [], []>} : vector<8x32xbf16>, vector<32x8xbf16>, vector<8x8xf32> -> vector<8x8xf32>
    %36 = vector.broadcast %33 : vector<8x1xf32> to vector<8x8xf32>
    %37 = arith.addf %35, %36 : vector<8x8xf32>
    %38 = vector.broadcast %34 : vector<1x8xf32> to vector<8x8xf32>
    %39 = arith.addf %37, %38 : vector<8x8xf32>
    %c0_26 = arith.constant 0 : index
    %c2_27 = arith.constant 2 : index
    %c0_28 = arith.constant 0 : index
    %c0_29 = arith.constant 0 : index
    %40 = vector.load %arg8[%c0_26, %c2_27, %c0_28, %c0_29] : memref<1x4x8x8xf32, #tpu.memory_space<vmem>>, vector<1x1x8x8xf32>
    %41 = vector.shape_cast %40 : vector<1x1x8x8xf32> to vector<8x8xf32>
    %42 = vector.shape_cast %39 : vector<8x8xf32> to vector<1x1x8x8xf32>
    tpu.vector_store %arg8[%c0_26, %c2_27, %c0_28, %c0_29], %42 {strides = array<i32>} : memref<1x4x8x8xf32, #tpu.memory_space<vmem>>, vector<1x1x8x8xf32>,
    %c96 = arith.constant 96 : index
    %c0_30 = arith.constant 0 : index
    %43 = vector.load %arg9[%c96, %c0_30] : memref<128x8xbf16, #tpu.memory_space<vmem>>, vector<32x8xbf16>
    %44 = vector.extract_strided_slice %9 {offsets = [0, 3], sizes = [8, 1], strides = [1, 1]} : vector<8x4xf32> to vector<8x1xf32>
    %c3 = arith.constant 3 : index
    %c0_31 = arith.constant 0 : index
    %45 = vector.load %arg10[%c3, %c0_31] : memref<4x8xf32, #tpu.memory_space<vmem>>, vector<1x8xf32>
    %cst_32 = arith.constant dense<0.000000e+00> : vector<8x8xf32>
    %46 = tpu.matmul %4, %43, %cst_32 {dimension_numbers = #tpu.dot_dimension_numbers<[1], [0], [0], [1], [0, 0, 1, 1], [], []>} : vector<8x32xbf16>, vector<32x8xbf16>, vector<8x8xf32> -> vector<8x8xf32>
    %47 = vector.broadcast %44 : vector<8x1xf32> to vector<8x8xf32>
    %48 = arith.addf %46, %47 : vector<8x8xf32>
    %49 = vector.broadcast %45 : vector<1x8xf32> to vector<8x8xf32>
    %50 = arith.addf %48, %49 : vector<8x8xf32>
    %c0_33 = arith.constant 0 : index
    %c3_34 = arith.constant 3 : index
    %c0_35 = arith.constant 0 : index
    %c0_36 = arith.constant 0 : index
    %51 = vector.load %arg8[%c0_33, %c3_34, %c0_35, %c0_36] : memref<1x4x8x8xf32, #tpu.memory_space<vmem>>, vector<1x1x8x8xf32>
    %52 = vector.shape_cast %51 : vector<1x1x8x8xf32> to vector<8x8xf32>
    %53 = vector.shape_cast %50 : vector<8x8xf32> to vector<1x1x8x8xf32>
    tpu.vector_store %arg8[%c0_33, %c3_34, %c0_35, %c0_36], %53 {strides = array<i32>} : memref<1x4x8x8xf32, #tpu.memory_space<vmem>>, vector<1x1x8x8xf32>,
    return
  }
  func.func @transform_0(%arg0: i32, %arg1: i32) -> (i32, i32, i32) {
    %c0_i32 = arith.constant 0 : i32
    %c0_i32_0 = arith.constant 0 : i32
    %c0_i32_1 = arith.constant 0 : i32
    return %arg0, %c0_i32, %c0_i32_0 : i32, i32, i32
  }
  func.func @transform_1(%arg0: i32, %arg1: i32) -> (i32, i32, i32) {
    %c0_i32 = arith.constant 0 : i32
    %c0_i32_0 = arith.constant 0 : i32
    return %arg0, %arg1, %c0_i32 : i32, i32, i32
  }
  func.func @transform_2(%arg0: i32, %arg1: i32) -> (i32, i32) {
    %c0_i32 = arith.constant 0 : i32
    %c0_i32_0 = arith.constant 0 : i32
    %c0_i32_1 = arith.constant 0 : i32
    return %c0_i32, %c0_i32_0 : i32, i32
  }
  func.func @transform_3(%arg0: i32, %arg1: i32) -> (i32, i32) {
    %c0_i32 = arith.constant 0 : i32
    %c0_i32_0 = arith.constant 0 : i32
    %c0_i32_1 = arith.constant 0 : i32
    return %c0_i32, %c0_i32_0 : i32, i32
  }
  func.func @transform_4(%arg0: i32, %arg1: i32) -> (i32, i32) {
    %c0_i32 = arith.constant 0 : i32
    %c0_i32_0 = arith.constant 0 : i32
    %c0_i32_1 = arith.constant 0 : i32
    return %c0_i32, %c0_i32_0 : i32, i32
  }
  func.func @transform_5(%arg0: i32, %arg1: i32) -> (i32, i32) {
    %c0_i32 = arith.constant 0 : i32
    %c0_i32_0 = arith.constant 0 : i32
    %c0_i32_1 = arith.constant 0 : i32
    return %c0_i32, %c0_i32_0 : i32, i32
  }
  func.func @transform_6(%arg0: i32, %arg1: i32) -> (i32, i32, i32, i32) {
    %c0_i32 = arith.constant 0 : i32
    %c0_i32_0 = arith.constant 0 : i32
    %c0_i32_1 = arith.constant 0 : i32
    return %arg0, %c0_i32, %arg1, %c0_i32_0 : i32, i32, i32, i32
  }
}

</mosaic_0001>

<bundles_post_ra>
// kernel: tpu_custom_call.1
= control target key start
LH: loop header
LB: loop body
LE: loop exit
PB: predicated region body
PF: predicated region fallthrough
CT: control target
= control target key end

     0   :  { %11 = vsyncpa [#allocation5], 0  ;;  %s1466_s0 = inlined_call_operand.vmem [shape: bf16[2,8,32], index: 0, kind: input, shape index: {}]   ;;  %s1467_s1 = inlined_call_operand.vmem [shape: bf16[2,8,32], index: 1, kind: input, shape index: {}]   ;;  %s1468_s2 = inlined_call_operand.vmem [shape: bf16[128,32], index: 2, kind: input, shape index: {}]   ;;  %s1469_s3 = inlined_call_operand.vmem [shape: bf16[4,32], index: 3, kind: input, shape index: {}]   ;;  %s1470_s4 = inlined_call_operand.vmem [shape: bf16[4,32], index: 4, kind: input, shape index: {}]   ;;  %s1471_s5 = inlined_call_operand.vmem [shape: f32[1,4], index: 5, kind: input, shape index: {}]   ;;  %s1472_s6 = inlined_call_operand.hbm [shape: f32[2,4,8,8], index: 6, kind: output, shape index: {}]  }
   0x1   :  { %13 = vsyncpa [#allocation5 + $0x1], 0  ;;  %s1246_s21 = smov 0   ;;  %s1248_s22 = smov 0  }
   0x2   :  { %s1250_s23 = smov 0   ;;  %s1252_s24 = smov 0  }
   0x3   :  { %s1254_s25 = smov 0   ;;  %s1256_s26 = smov 0  }
   0x4 LB: > { %s914_s27 = sadd.s32 4294967295, %s1200_s26   ;;  %s915_s28 = sadd.s32 4294967294, %s1200_s26   ;;  %s1200_s26 = sphi %s1256_s26, %s19_s26   ;;  %s1196_s25 = sphi %s1254_s25, %s1479_s25   ;;  %s1192_s24 = sphi %s1252_s24, %s1478_s24   ;;  %s1188_s23 = sphi %s1250_s23, %s1477_s23   ;;  %s1184_s22 = sphi %s1248_s22, %s1476_s22   ;;  %s1180_s21 = sphi %s1246_s21, %s1475_s21  }
   0x5   : > { %s31_s29 = sadd.s32 1, %s1196_s25  ;;  %s178_s30 = sadd.s32 1, %s1188_s23 }
   0x6   : > { %p33_p0 = scmp.ge.s32.totalorder %s31_s29, 2  ;;  %p188_p1 = scmp.ne.s32.totalorder %s1188_s23, %s1184_s22 }
   0x7   : > { %p189_p2 = scmp.eq.s32.totalorder %s914_s27, 1  ;;  %p194_p3 = scmp.ne.s32.totalorder %s1184_s22, %s1180_s21 }
   0x8   : > { %s1481_s29 = smov (%p33_p0, %s31_s29), 0  ;;  %p195_p5 = scmp.eq.s32.totalorder %s915_s28, 1 }
   0x9   : > { %p1286_p4 = por %p189_p2, %p188_p1  ;;  %s173_s8 = ssub.s32 %s1196_s25, %s1481_s29 }
   0xa   : > { %p918_p6 = scmp.ge.s32.totalorder %s1200_s26, 1  ;;  %p176_p7 = scmp.eq.s32.totalorder %s173_s8, 0 }
   0xb   : > { %p1293_p8 = por %p195_p5, %p194_p3  ;;  %p242_p9 = scmp.lt.s32.totalorder %s1200_s26, 3 }
   0xc   : > { %s1299_s10 = scalar_select %p176_p7, %s1188_s23, %s178_s30  }
   0xd   : > { %p243_p10 = pnand %p918_p6, %p242_p9 }
   0xe   : > { %p278_p11 = scmp.lt.s32.totalorder (!%p243_p10), %s1192_s24, 1  ;;  %v1114_v0 = vld [vmem:[%s1468_s2] sm:$0xff] (!%p243_p10)   ;;  %vm351_vm0 = vcmask (!%p243_p10), 261120   ;;  %v1202_v1 = vmov (!%p243_p10), 0.0   ;;  %vm1203_vm1 = vmmov (!%p243_p10), 0   ;;  %v1115_v5 = vld [vmem:[%s1468_s2 + $0x8] sm:$0xff] (!%p243_p10)  }
   0xf   : > { %246 = sbr.rel (%p243_p10) target bundleno = 522 (0x20a), region = 44  ;;  %1001 = vmatprep.subr.bf16.mxu1 (!%p243_p10), %v1202_v1  ;;  %985 = vmatprep.mubr.msk.bf16.mxu0 (!%p243_p10), %vm351_vm0, %v1114_v0  ;;  %v540_v4 = vld [vmem:[%s1469_s3] sm:$0x3] (!%p243_p10)  ;;  %v1116_v6 = vld [vmem:[%s1468_s2 + $0x10] sm:$0xff] (!%p243_p10)   ;;  %v1117_v9 = vld [vmem:[%s1468_s2 + $0x18] sm:$0xff] (!%p243_p10)   ;;  %v1204_v15 = vmov (!%p243_p10), 0  }
  0x10   : > { %1003 = vmatprep.mubr.msk.bf16.mxu1 (!%p243_p10), %vm1203_vm1, %v1202_v1  ;;  %v493_v7 = vld [vmem:[%s1470_s4] sm:$0x3] (!%p243_p10)  ;;  %v553_v8 = vsel (!%p243_p10), %vm351_vm0, %v540_v4, 0  ;;  %v1119_v12 = vld [vmem:[%s1468_s2 + $0x28] sm:$0xff] (!%p243_p10)   ;;  %v1120_v13 = vld [vmem:[%s1468_s2 + $0x30] sm:$0xff] (!%p243_p10)   ;;  %1109 = vset.pattern.permute.xlu0 (!%p243_p10), %v1204_v15  ;;  %v1205_v16 = vmov (!%p243_p10), 2  }
  0x11   : > { %v1118_v11 = vld [vmem:[%s1468_s2 + $0x20] sm:$0xff] (!%p243_p10)   ;;  %v1121_v14 = vld [vmem:[%s1468_s2 + $0x38] sm:$0xff] (!%p243_p10)   ;;  %1111 = vset.pattern.permute.xlu1 (!%p243_p10), %v1205_v16  ;;  %vm537_vm2 = vcmask (!%p243_p10), 60416   ;;  %vm484_vm3 = vcmask (!%p243_p10), 64512   ;;  %v1206_v40 = vmov (!%p243_p10), 1   ;;  %v1207_v42 = vmov (!%p243_p10), 3  }
  0x12   : > { %v939_v27 = vld [vmem:[%s1471_s5] ss:$0 sm:$0xff] (!%p243_p10)  ;;  %s957_s18 = sshll.u32 (!%p243_p10), %s1192_s24, 9  ;;  %s1208_s28 = smov (!%p243_p10), [#allocation4]  }
  0x13   : > { %s1412_s20 = scalar_lea.hbm (!%p243_p10), %s1472_s6, %s957_s18  ;;  %s1126_s30 = sshll.u32 (!%p243_p10), %s1208_s28, 4  ;;  %s1127_s30 = int_to_ptr.vmem [resolvable:$false] %s1126_s30 }
  0x14   : > { %s1128_s8 = scalar_lea.vmem (!%p243_p10), %s1127_s30, 1024 }
  0x16   : > { %s279_s13 = scalar_select %p278_p11, %s1192_s24, 1 }
  0x18   : > { %s920_s14 = sshll.u32 %s279_s13, 2  ;;  %s275_s13 = sand.u32 1, %s1184_s22  }
  0x19   : > { %s281_s17 = scalar_lea.vmem %s1466_s0, %s920_s14  ;;  %s288_s15 = scalar_lea.vmem %s1467_s1, %s920_s14 }
  0x1a   : > { %v294_v2 = vld [vmem:[%s281_s17] sm:$0xf]  ;;  %s1420_s24 = scalar_lea.sflag [#allocation5], %s275_s13 }
  0x1b   : > { %1045 = vmatprep.subr.msk.bf16.mxu0 %vm351_vm0, %v294_v2  ;;  %v377_v3 = vsel %vm351_vm0, %v294_v2, 0  ;;  %v1342_v10 = vld [vmem:[%s288_s15] sm:$0xf]  ;;  %s919_s15 = sshll.u32 %s275_s13, 5 }
  0x1c   : > { %984 = vmatpush3.bf16.xpose.msra.mxu0 %v377_v3  ;;  %1002 = vmatpush3.bf16.xpose.msra.mxu1 %v377_v3  ;;  %s1399_s16 = scalar_lea.vmem [#allocation4], %s919_s15 }
  0x1d   : > { %1007 = vmatprep.subr.bf16.mxu1 %v1202_v1  ;;  %1029 = vmatprep.subr.bf16.mxu0 %v1202_v1  ;;  %s827_s17 = sshll.u32 %s1399_s16, 4  ;;  %s1414_s17 = int_to_ptr.vmem [resolvable:$true] %s827_s17 }
  0x1e   : > { %s1122_s27 = scalar_lea.vmem %s1414_s17, 512  ;;  %p1129_p1 = scmp.lt.s32.totalorder %s1414_s17, %s1127_s30 }
  0x1f   : > { %p1123_p12 = scmp.ne.s32.totalorder %s1414_s17, %s1122_s27  ;;  %p1130_p2 = scmp.lt.s32.totalorder %s1128_s8, %s1122_s27 }
  0x21   : > { %p1124_p13 = pnand %p1123_p12, %p1286_p4  ;;  %p1131_p3 = por %p1130_p2, %p1129_p1 }
  0x23   : > { %986 = vmatmul.mubr.msk.bf16.vlgmr.msra.gmra.mrb[0].mxu0 %vm351_vm0, %v1115_v5  ;;  %1004 = vmatmul.mubr.msk.bf16.vlgmr.msra.gmra.mrb[0].mxu1 %vm351_vm0, %v493_v7  ;;  %p1125_p0 = pneg %p1124_p13 }
  0x24   : > { %989 = vmatprep.mubr.msk.bf16.mxu0 %vm351_vm0, %v1116_v6  ;;  %1008 = vmatpush3.bf16.xpose.msra.mxu1 %v553_v8 }
  0x25   : > { %1009 = vmatprep.mubr.msk.bf16.mxu1 %vm1203_vm1, %v1202_v1  ;;  %1013 = vmatprep.subr.bf16.mxu1 %v1202_v1  ;;  %p1132_p5 = pnand %p1131_p3, %p1125_p0 }
  0x2b   : > { %990 = vmatmul.mubr.msk.bf16.gmra.mrb[4].mxu0 %vm351_vm0, %v1117_v9  ;;  %1010 = vmatmul.mubr.msk.bf16.vlgmr.msra.gmra.mrb[4].mxu1 %vm351_vm0, %v1342_v10 }
  0x2c   : > { %993 = vmatprep.mubr.msk.bf16.mxu0 %vm351_vm0, %v1118_v11  ;;  %1017 = vmatprep.mubr.msk.bf16.mxu1 %vm1203_vm1, %v1202_v1 }
  0x33   : > { %994 = vmatmul.mubr.msk.bf16.gmra.mrb[8].mxu0 %vm351_vm0, %v1119_v12 }
  0x34   : > { %997 = vmatprep.mubr.msk.bf16.mxu0 %vm351_vm0, %v1120_v13 }
  0x3b   : > { %998 = vmatmul.mubr.msk.bf16.gmra.mrb[12].mxu0 %vm351_vm0, %v1121_v14 }
  0x3c   : > { %1033 = vmatprep.mubr.msk.bf16.mxu0 %vm1203_vm1, %v1202_v1 }
  0xf6   : > { %v987_v17 = vpop.f32.mrb[0].mxu0  ;;  %v531_v18 = vpop.f32.mrb[0].mxu1 }
  0xf7   : > { %v413_v19 = vpop.f32.mrb[1].mxu0  ;;  %538 = vst.msk [vmem:[#allocation3] sm:$0xf] %vm537_vm2, %v531_v18  ;;  %v1005_v20 = vpop.f32.mrb[1].mxu1 }
  0xf8   : > { %v988_v21 = vpop.f32.mrb[2].mxu0  ;;  %v534_v22 = vpop.f32.mrb[2].mxu1 }
  0xf9   : > { %v477_v23 = vpack.c.bf16 %v988_v21, %v987_v17  ;;  %v416_v24 = vpop.f32.mrb[3].mxu0  ;;  %v1006_v25 = vpop.f32.mrb[3].mxu1 }
  0xfa   : > { %v476_v26 = vpack.c.bf16 %v416_v24, %v413_v19 }
  0xfb   : > { %486 = vst.msk [vmem:[#allocation2 + $0x8] sm:$0xff] %vm484_vm3, %v477_v23 }
  0xfc   : > { %485 = vst.msk [vmem:[#allocation2] sm:$0xff] %vm484_vm3, %v476_v26 }
  0xfe   : > { %v991_v28 = vpop.f32.mrb[4].mxu0  ;;  %v589_v29 = vpop.f32.mrb[4].mxu1  ;;  %v942_v2 = vld [vmem:[#allocation3] ss:$0 sm:$0xff]  ;;  %v944_v9 = vld [vmem:[#allocation3 + $0x1] ss:$0 sm:$0xff] }
  0xff   : > { %v429_v30 = vpop.f32.mrb[5].mxu0  ;;  %v590_v31 = vadd.f32 %v939_v27, %v589_v29  ;;  %v1011_v32 = vpop.f32.mrb[5].mxu1  ;;  %v947_v17 = vld [vmem:[#allocation3 + $0x2] ss:$0 sm:$0xff]  ;;  %v950_v25 = vld [vmem:[#allocation3 + $0x3] ss:$0 sm:$0xff] }
 0x100   : > { %v992_v33 = vpop.f32.mrb[6].mxu0  ;;  %v592_v34 = vpop.f32.mrb[6].mxu1 }
 0x101   : > { %v479_v35 = vpack.c.bf16 %v992_v33, %v991_v28  ;;  %v432_v36 = vpop.f32.mrb[7].mxu0  ;;  %600 = vperm.xlu0 %1109, %v590_v31   ;;  %708 = vperm.xlu1 %1111, %v590_v31   ;;  %v1012_v37 = vpop.f32.mrb[7].mxu1 }
 0x102   : > { %v478_v38 = vpack.c.bf16 %v432_v36, %v429_v30  ;;  %v596_v44 = vld [vmem:[#allocation2 + $0x8] sm:$0xff] }
 0x103   : > { %488 = vst.msk [vmem:[#allocation2 + $0x18] sm:$0xff] %vm484_vm3, %v479_v35  ;;  %v595_v39 = vld [vmem:[#allocation2] sm:$0xff] }
 0x104   : > { %487 = vst.msk [vmem:[#allocation2 + $0x10] sm:$0xff] %vm484_vm3, %v478_v38  ;;  %1014 = vmatpush3.bf16.msra.mxu1 %v595_v39 }
 0x105   : > { %1015 = vmatprep.subr.bf16.mxu1 %v1202_v1  ;;  %1110 = vset.pattern.permute.xlu0 %v1206_v40 }
 0x106   : > { %v995_v41 = vpop.f32.mrb[8].mxu0  ;;  %654 = vperm.xlu0 %1110, %v590_v31   ;;  %1112 = vset.pattern.permute.xlu1 %v1207_v42 }
 0x107   : > { %v445_v43 = vpop.f32.mrb[9].mxu0  ;;  %762 = vperm.xlu1 %1112, %v590_v31  }
 0x108   : > { %v996_v45 = vpop.f32.mrb[10].mxu0  ;;  %1016 = vmatpush3.bf16.msra.mxu1 %v596_v44 }
 0x109   : > { %v481_v46 = vpack.c.bf16 %v996_v45, %v995_v41  ;;  %v448_v47 = vpop.f32.mrb[11].mxu0  ;;  %1021 = vmatprep.subr.bf16.mxu1 %v1202_v1 }
 0x10a   : > { %v480_v48 = vpack.c.bf16 %v448_v47, %v445_v43  ;;  %1113 = vset.pattern.permute.xlu0 %v1207_v42  ;;  %v651_v52 = vld [vmem:[#allocation2 + $0x18] sm:$0xff] }
 0x10b   : > { %490 = vst.msk [vmem:[#allocation2 + $0x28] sm:$0xff] %vm484_vm3, %v481_v46  ;;  %1018 = vmatmul.mubr.msk.bf16.vlgmr.msra.gmra.mrb[8].mxu1 %vm351_vm0, %v1342_v10  ;;  %v650_v49 = vld [vmem:[#allocation2 + $0x10] sm:$0xff] }
 0x10c   : > { %489 = vst.msk [vmem:[#allocation2 + $0x20] sm:$0xff] %vm484_vm3, %v480_v48  ;;  %1022 = vmatpush3.bf16.msra.mxu1 %v650_v49  ;;  %1025 = vmatprep.mubr.msk.bf16.mxu1 %vm1203_vm1, %v1202_v1 }
 0x10d   : > { %1023 = vmatprep.subr.bf16.mxu1 %v1202_v1 }
 0x10e   : > { %v999_v50 = vpop.f32.mrb[12].mxu0 }
 0x10f   : > { %v461_v51 = vpop.f32.mrb[13].mxu0 }
 0x110   : > { %v1000_v53 = vpop.f32.mrb[14].mxu0  ;;  %1024 = vmatpush3.bf16.msra.mxu1 %v651_v52 }
 0x111   : > { %v483_v54 = vpack.c.bf16 %v1000_v53, %v999_v50  ;;  %v464_v55 = vpop.f32.mrb[15].mxu0  ;;  %1037 = vmatprep.subr.bf16.mxu1 %v1202_v1 }
 0x112   : > { %v482_v56 = vpack.c.bf16 %v464_v55, %v461_v51  ;;  %v705_v58 = vld [vmem:[#allocation2 + $0x28] sm:$0xff] }
 0x113   : > { %492 = vst.msk [vmem:[#allocation2 + $0x38] sm:$0xff] %vm484_vm3, %v483_v54  ;;  %1026 = vmatmul.mubr.msk.bf16.vlgmr.msra.gmra.mrb[12].mxu1 %vm351_vm0, %v1342_v10  ;;  %v704_v57 = vld [vmem:[#allocation2 + $0x20] sm:$0xff] }
 0x114   : > { %491 = vst.msk [vmem:[#allocation2 + $0x30] sm:$0xff] %vm484_vm3, %v482_v56  ;;  %1030 = vmatpush3.bf16.msra.mxu0 %v704_v57  ;;  %1041 = vmatprep.mubr.msk.bf16.mxu1 %vm1203_vm1, %v1202_v1 }
 0x115   : > { %1031 = vmatprep.subr.bf16.mxu0 %v1202_v1 }
 0x118   : > { %1032 = vmatpush3.bf16.msra.mxu0 %v705_v58 }
 0x11a   : > { %v759_v60 = vld [vmem:[#allocation2 + $0x38] sm:$0xff] }
 0x11b   : > { %1034 = vmatmul.mubr.msk.bf16.vlgmr.msra.gmra.mrb[16].mxu0 %vm351_vm0, %v1342_v10  ;;  %v758_v59 = vld [vmem:[#allocation2 + $0x30] sm:$0xff] }
 0x11c   : > { %1038 = vmatpush3.bf16.msra.mxu1 %v758_v59 }
 0x11d   : > { %1039 = vmatprep.subr.bf16.mxu1 %v1202_v1 }
 0x120   : > { %1040 = vmatpush3.bf16.msra.mxu1 %v759_v60 }
 0x123   : > { %1042 = vmatmul.mubr.msk.bf16.vlgmr.msra.gmra.mrb[16].mxu1 %vm351_vm0, %v1342_v10 }
 0x180   : > { %v601_v61 = vpop.permute.xlu0 %600  ;;  %v709_v13 = vpop.permute.xlu1 %708 }
 0x185   : > { %v655_v1 = vpop.permute.xlu0 %654 }
 0x186   : > { %v763_v21 = vpop.permute.xlu1 %762 }
 0x1de   : > { %v637_v62 = vpop.f32.mrb[8].mxu1 }
 0x1df   : > { %v638_v63 = vadd.f32 %v637_v62, %v601_v61  ;;  %v1019_v0 = vpop.f32.mrb[9].mxu1 }
 0x1e0   : > { %v640_v3 = vpop.f32.mrb[10].mxu1 }
 0x1e1   : > { %v647_v4 = vadd.f32 %v942_v2, %v638_v63  ;;  %v1020_v5 = vpop.f32.mrb[11].mxu1 }
 0x1e3   : > { %649 = vst.msk [vmem:[%s1399_s16] sm:$0xff] %vm484_vm3, %v647_v4 }
 0x1e6   : > { %v691_v6 = vpop.f32.mrb[12].mxu1 }
 0x1e7   : > { %v692_v7 = vadd.f32 %v691_v6, %v655_v1  ;;  %v1027_v8 = vpop.f32.mrb[13].mxu1 }
 0x1e8   : > { %v694_v10 = vpop.f32.mrb[14].mxu1 }
 0x1e9   : > { %v701_v11 = vadd.f32 %v944_v9, %v692_v7  ;;  %v1028_v12 = vpop.f32.mrb[15].mxu1 }
 0x1eb   : > { %945 = vst.msk [vmem:[%s1399_s16 + $0x8] sm:$0xff] %vm484_vm3, %v701_v11 }
 0x1ee   : > { %v745_v14 = vpop.f32.mrb[16].mxu0 }
 0x1ef   : > { %v746_v15 = vadd.f32 %v745_v14, %v709_v13  ;;  %v1035_v16 = vpop.f32.mrb[17].mxu0 }
 0x1f0   : > { %v748_v18 = vpop.f32.mrb[18].mxu0 }
 0x1f1   : > { %v755_v19 = vadd.f32 %v947_v17, %v746_v15  ;;  %v1036_v20 = vpop.f32.mrb[19].mxu0 }
 0x1f3   : > { %948 = vst.msk [vmem:[%s1399_s16 + $0x10] sm:$0xff] %vm484_vm3, %v755_v19 }
 0x1f6   : > { %v799_v22 = vpop.f32.mrb[16].mxu1 }
 0x1f7   : > { %v800_v23 = vadd.f32 %v799_v22, %v763_v21  ;;  %v1043_v24 = vpop.f32.mrb[17].mxu1 }
 0x1f8   : > { %v802_v26 = vpop.f32.mrb[18].mxu1 }
 0x1f9   : > { %v809_v27 = vadd.f32 %v950_v25, %v800_v23  ;;  %v1044_v28 = vpop.f32.mrb[19].mxu1 }
 0x1fb   : > { %951 = vst.msk [vmem:[%s1399_s16 + $0x18] sm:$0xff] %vm484_vm3, %v809_v27 }
 0x1fc   : > { %1135 = shalt.err (!%p1132_p5)
}
 0x1fd   : > { %s1136_s11 = scalar_lea.hbm %s1412_s20, 512  ;;  %s1140_s15 = scalar_lea.hbm %s1472_s6, 1024 }
 0x1fe   : > { %p1137_p6 = scmp.ne.s32.totalorder %s1412_s20, %s1136_s11  ;;  %p1141_p10 = scmp.lt.u32.totalorder %s1412_s20, %s1472_s6 }
 0x1ff   : > { %p1142_p11 = scmp.lt.u32.totalorder %s1140_s15, %s1136_s11  ;;  %p1144_p13 = scmp.lt.u32.totalorder %s1136_s11, %s1412_s20 }
 0x200   : > { %p1138_p7 = pnand %p1137_p6, %p1286_p4 }
 0x201   : > { %p1143_p12 = por %p1142_p11, %p1141_p10 }
 0x202   : > { %p1139_p9 = pneg %p1138_p7 }
 0x203   : > { %p1145_p0 = por %p1144_p13, %p1143_p12 }
 0x205   : > { %p1146_p1 = pnand %p1145_p0, %p1139_p9 }
 0x207   : > { %1149 = shalt.err (!%p1146_p1)
}
 0x208   : > { %s1209_s19 = smov 128   ;;  %s1210_s14 = smov 8  }
 0x209   : > { %1046 = dma.vmem_to_hbm [thread:$0]  (%p1286_p4), %s1414_s17, 512, %s1412_s20, %s1420_s24, %s1209_s19, %s1209_s19, %s1210_s14  }
 0x20a PF: > { %p1052_p2 = scmp.ge.s32.totalorder %s1200_s26, 2  ;;  %s842_s27 = sand.u32 1, %s1180_s21  }
 0x20b   : > { %s843_s28 = scalar_lea.sflag [#allocation5], %s842_s27 }
 0x20c   : > { %p1049_p3 = pnand %p1052_p2, %p1293_p8 }
 0x20e   : > { %1175 = dma.done.wait (!%p1049_p3), %s843_s28, 512  }
 0x20f   : > { %1177 = vsyncadd (!%p1049_p3), %s843_s28, 4294966784  ;;  %s19_s26 = sadd.s32 1, %s1200_s26   ;;  %s1475_s21 = smov %s1184_s22 }
 0x210   : > { %p16_p5 = scmp.ge.s32.totalorder %s19_s26, 4   ;;  %s1476_s22 = smov %s1188_s23 }
 0x211   : > { %s1477_s23 = smov %s1299_s10  ;;  %s1478_s24 = smov %s1196_s25 }
 0x212   : > { %s1479_s25 = smov %s1481_s29  ;;  %18 = sbr.rel (!%p16_p5) target bundleno = 4 (0x4), region = 89 }
 0x219   :  { %848 = vsyncpa [#allocation5], 1 }
 0x21a   :  { %850 = vsyncpa [#allocation5 + $0x1], 1 }

</bundles_post_ra>
